<compile_context>
chip_gen: v6e
topology: v6e:2x2x1
jax: 0.10.0
libtpu: 0.0.40
codegen_flags: <defaults>
</compile_context>

<pallas_src>
import math

import numpy as np
import jax
import jax.numpy as jnp
from jax.experimental import pallas as pl
from jax.experimental.pallas import tpu as pltpu


def _round_up(v, m):
    return (v + m - 1) // m * m


_VMEM_BUDGET = 32 << 20   # conservative working-set budget across v5e/v6e/v7x


# ------------------------------ fused kernel ------------------------------- #

def _fused_msembed_kernel(x_ref, w_ref, b_ref, g_ref, beta_ref, o_ref):
    """Single matmul (folded conv+proj) + bias + LayerNorm.

    x_ref    : (tn, K_pad)   bf16   rows = (b,h), cols = (c, w) zero-padded
    w_ref    : (K_pad, D)    bf16   folded conv+projection weight
    b_ref    : (1, D)        f32    folded bias (proj bias + conv bias @ proj)
    g_ref    : (1, D)        f32    LayerNorm gamma
    beta_ref : (1, D)        f32    LayerNorm beta
    o_ref    : (tn, D)       f32
    """
    y = jnp.dot(x_ref[...], w_ref[...], preferred_element_type=jnp.float32)
    y = y + b_ref[...]
    # LayerNorm (biased variance, eps=1e-5, affine) over the true D — f32.
    mean = jnp.mean(y, axis=-1, keepdims=True)
    var = jnp.mean((y - mean) ** 2, axis=-1, keepdims=True)
    y_hat = (y - mean) * jax.lax.rsqrt(var + 1e-5)
    o_ref[...] = (y_hat * g_ref[...] + beta_ref[...]).astype(o_ref.dtype)


# ------------------------------ module wrapper ------------------------------ #

class MultiScaleEmbeddingPallas:
    def __init__(self, in_channels, out_channels, sampling_point, dim,
                 kernel_lengths, stride, key):
        assert all(k % 2 == 1 for k in kernel_lengths), \
            "odd kernel lengths required (matches the torch module's out_w formula)"
        self.in_channels = in_channels
        self.out_channels = out_channels
        self.sampling_point = sampling_point
        self.dim = dim
        self.kernel_lengths = tuple(kernel_lengths)
        self.stride = stride

        C, OC, L, W = in_channels, out_channels, len(kernel_lengths), sampling_point
        k_max = max(kernel_lengths)
        self.out_w = (W - k_max + (k_max - 1) // 2 * 2) // stride + 1
        self.feat_dim = L * OC * self.out_w

        # ---- parameter init (PyTorch-style uniform), kept in f32 ----
        keys = jax.random.split(key, 2 * L + 2)
        self.conv_w, self.conv_b = [], []
        for idx, k in enumerate(kernel_lengths):
            bound = 1.0 / math.sqrt(C * k)
            self.conv_w.append(jax.random.uniform(
                keys[2 * idx], (OC, C, 1, k), minval=-bound, maxval=bound,
                dtype=jnp.float32))
            self.conv_b.append(jax.random.uniform(
                keys[2 * idx + 1], (OC,), minval=-bound, maxval=bound,
                dtype=jnp.float32))
        bound = 1.0 / math.sqrt(self.feat_dim)
        self.proj_w = jax.random.uniform(keys[-2], (self.feat_dim, dim),
                                         minval=-bound, maxval=bound,
                                         dtype=jnp.float32)
        self.proj_b = jax.random.uniform(keys[-1], (dim,),
                                         minval=-bound, maxval=bound,
                                         dtype=jnp.float32)
        self.ln_g = jnp.ones((dim,), jnp.float32)
        self.ln_b = jnp.zeros((dim,), jnp.float32)

        # ---- fold conv-stack + rearrange + Linear into ONE affine map ------ #
        # Done once on the host in f32 (exact linear algebra), then cast bf16.
        proj3 = np.asarray(self.proj_w, np.float32).reshape(L, OC, self.out_w, dim)
        A = np.zeros((C, W, dim), np.float32)             # (c, w_in, d)
        b_eff = np.array(self.proj_b, np.float32)
        for s, k in enumerate(kernel_lengths):
            pad_s = (k - 1) // 2
            wk = np.asarray(self.conv_w[s], np.float32)[:, :, 0, :]     # (OC, C, k)
            # G[i, w_out, t] = 1 iff w_out*stride - pad_s + t == i (inside [0, W))
            pos = np.arange(self.out_w)[:, None] * stride - pad_s + np.arange(k)[None, :]
            G = (np.arange(W)[:, None, None] == pos[None]).astype(np.float32)
            A += np.einsum('iwt,oct,owd->cid', G, wk, proj3[s], optimize=True)
            b_eff += np.einsum('o,owd->d', np.asarray(self.conv_b[s], np.float32),
                               proj3[s], optimize=True)

        self.k_col = C * W                                # true contraction dim
        self.k_pad = _round_up(self.k_col, 128)           # lane-dense, MXU-deep
        w_fold = np.zeros((self.k_pad, dim), np.float32)
        w_fold[:self.k_col] = A.reshape(self.k_col, dim)
        self.w_fold = jnp.asarray(w_fold, dtype=jnp.bfloat16)
        self.b_eff = jnp.asarray(b_eff, dtype=jnp.float32).reshape(1, dim)
        self.g_row = self.ln_g.reshape(1, dim)
        self.beta_row = self.ln_b.reshape(1, dim)

    # ------------------------------ forward -------------------------------- #
    def __call__(self, x):
        # x: (B, C_in, H, W) f32, NCHW like the PyTorch module.
        B, C, H, W = x.shape
        assert C == self.in_channels and W == self.sampling_point
        N = B * H
        D = self.dim
        K, K_pad = self.k_col, self.k_pad

        # Flatten rows to (b,h) x (c,w): one transpose + bf16 cast.  No im2col.
        x2 = jnp.transpose(x, (0, 2, 1, 3)).reshape(N, K).astype(jnp.bfloat16)

        # ---- row tile from a VMEM budget; >= 2 grid steps when N allows ----
        bytes_per_row = 2 * (K_pad * 2) + 2 * (D * 4)     # dbl-buf bf16 in + f32 out
        const_bytes = K_pad * D * 2 + 3 * D * 4           # resident weight + vectors
        tn_cap = (_VMEM_BUDGET - const_bytes) // bytes_per_row
        tn_cap = max(16, min(2048, (tn_cap // 16) * 16))
        tn_split = _round_up(max(-(-N // 2), 16), 16)     # ceil(N/2), >=16, mult of 16
        tn = min(tn_cap, tn_split)
        n_pad = _round_up(N, tn)
        grid = (n_pad // tn,)

        x2 = jnp.pad(x2, ((0, n_pad - N), (0, K_pad - K)))

        ws_bytes = const_bytes + tn * bytes_per_row
        vmem_limit = int(min(64 << 20, max(ws_bytes + (4 << 20), 16 << 20)))

        flops = 2 * n_pad * K_pad * D + 10 * n_pad * D
        bytes_accessed = (2 * (n_pad * K_pad + K_pad * D)      # bf16 operands
                          + 4 * (3 * D + n_pad * D))            # f32 vectors + out

        out = pl.pallas_call(
            _fused_msembed_kernel,
            out_shape=jax.ShapeDtypeStruct((n_pad, D), jnp.float32),
            grid=grid,
            in_specs=[
                pl.BlockSpec((tn, K_pad), lambda i: (i, 0)),
                pl.BlockSpec((K_pad, D), lambda i: (0, 0)),
                pl.BlockSpec((1, D), lambda i: (0, 0)),
                pl.BlockSpec((1, D), lambda i: (0, 0)),
                pl.BlockSpec((1, D), lambda i: (0, 0)),
            ],
            out_specs=pl.BlockSpec((tn, D), lambda i: (i, 0)),
            compiler_params=pltpu.CompilerParams(
                dimension_semantics=("parallel",),
                vmem_limit_bytes=vmem_limit),
            cost_estimate=pl.CostEstimate(
                flops=int(flops), transcendentals=int(n_pad),
                bytes_accessed=int(bytes_accessed)),
        )(x2, self.w_fold, self.b_eff, self.g_row, self.beta_row)

        return out[:N].reshape(B, H, D)

    # ---------------- pure-JAX f32 reference (lax.conv) for checking -------- #
    def reference(self, x):
        feats = []
        for k, w, b in zip(self.kernel_lengths, self.conv_w, self.conv_b):
            pad = (k - 1) // 2
            y = jax.lax.conv_general_dilated(
                x, w, window_strides=(1, self.stride),
                padding=((0, 0), (pad, pad)),
                dimension_numbers=("NCHW", "OIHW", "NCHW"))
            feats.append(y + b[None, :, None, None])
        f = jnp.concatenate(feats, axis=1)               # (B, L*OC, H, out_w)
        B, Ctot, H, Wout = f.shape
        f = jnp.transpose(f, (0, 2, 1, 3)).reshape(B, H, Ctot * Wout)
        y = f @ self.proj_w + self.proj_b
        mean = y.mean(-1, keepdims=True)
        var = ((y - mean) ** 2).mean(-1, keepdims=True)
        return (y - mean) / jnp.sqrt(var + 1e-5) * self.ln_g + self.ln_b


# ----------------------------------- main ----------------------------------- #

if __name__ == "__main__":
    key = jax.random.PRNGKey(0)
    k_params, k_x = jax.random.split(key)

    B, C_in, H, W = 2, 4, 4, 16          # W == sampling_point
    module = MultiScaleEmbeddingPallas(
        in_channels=C_in, out_channels=8, sampling_point=W, dim=32,
        kernel_lengths=(3, 5, 7), stride=2, key=k_params)

    x = jax.random.normal(k_x, (B, C_in, H, W), dtype=jnp.float32)

    out = jax.block_until_ready(module(x))
    ref = jax.block_until_ready(module.reference(x))

    assert out.shape == (B, H, 32), out.shape
    # bf16 operands + f32 accumulation: semantic errors would be O(1), so a
    # 3e-2 tolerance still validates the folded-weight math against the f32 ref.
    if not bool(jnp.allclose(out, ref, rtol=3e-2, atol=3e-2)):
        raise AssertionError("Pallas output mismatch vs JAX reference")

    print("KERNEL_OK")
</pallas_src>

<mosaic_0001>
module attributes {stable_mosaic.version = 11 : i64} {
  func.func @_fused_msembed_kernel(%arg0: i32, %arg1: memref<16x128xbf16, #tpu.memory_space<vmem>>, %arg2: memref<128x32xbf16, #tpu.memory_space<vmem>>, %arg3: memref<1x32xf32, #tpu.memory_space<vmem>>, %arg4: memref<1x32xf32, #tpu.memory_space<vmem>>, %arg5: memref<1x32xf32, #tpu.memory_space<vmem>>, %arg6: memref<16x32xf32, #tpu.memory_space<vmem>>) attributes {dimension_semantics = [#tpu.dimension_semantics<parallel>], iteration_bounds = array<i64: 1>, scalar_prefetch = 0 : i64, scratch_operands = 0 : i64, tpu.core_type = #tpu.core_type<tc>, window_params = [{transform_indices = @transform_0, window_bounds = array<i64: 16, 128>}, {pipeline_mode = #tpu.pipeline_mode<synchronous>, transform_indices = @transform_1, window_bounds = array<i64: 128, 32>}, {pipeline_mode = #tpu.pipeline_mode<synchronous>, transform_indices = @transform_2, window_bounds = array<i64: 1, 32>}, {pipeline_mode = #tpu.pipeline_mode<synchronous>, transform_indices = @transform_3, window_bounds = array<i64: 1, 32>}, {pipeline_mode = #tpu.pipeline_mode<synchronous>, transform_indices = @transform_4, window_bounds = array<i64: 1, 32>}, {transform_indices = @transform_5, window_bounds = array<i64: 16, 32>}]} {
    %c0 = arith.constant 0 : index
    %c0_0 = arith.constant 0 : index
    %0 = vector.load %arg1[%c0, %c0_0] : memref<16x128xbf16, #tpu.memory_space<vmem>>, vector<16x128xbf16>
    %c0_1 = arith.constant 0 : index
    %c0_2 = arith.constant 0 : index
    %1 = vector.load %arg2[%c0_1, %c0_2] : memref<128x32xbf16, #tpu.memory_space<vmem>>, vector<128x32xbf16>
    %cst = arith.constant dense<0.000000e+00> : vector<16x32xf32>
    %2 = tpu.matmul %0, %1, %cst {dimension_numbers = #tpu.dot_dimension_numbers<[1], [0], [0], [1], [0, 0, 1, 1], [], []>} : vector<16x128xbf16>, vector<128x32xbf16>, vector<16x32xf32> -> vector<16x32xf32>
    %c0_3 = arith.constant 0 : index
    %c0_4 = arith.constant 0 : index
    %3 = vector.load %arg3[%c0_3, %c0_4] : memref<1x32xf32, #tpu.memory_space<vmem>>, vector<1x32xf32>
    %4 = vector.broadcast %3 : vector<1x32xf32> to vector<16x32xf32>
    %5 = arith.addf %2, %4 : vector<16x32xf32>
    %cst_5 = arith.constant dense<0.000000e+00> : vector<16xf32>
    %6 = vector.multi_reduction <add>, %5, %cst_5 [1] : vector<16x32xf32> to vector<16xf32>
    %7 = vector.shape_cast %6 : vector<16xf32> to vector<16x1xf32>
    %cst_6 = arith.constant 3.200000e+01 : f32
    %8 = vector.broadcast %cst_6 : f32 to vector<16x1xf32>
    %9 = arith.divf %7, %8 : vector<16x1xf32>
    %10 = vector.broadcast %9 : vector<16x1xf32> to vector<16x32xf32>
    %11 = arith.subf %5, %10 : vector<16x32xf32>
    %12 = arith.mulf %11, %11 : vector<16x32xf32>
    %cst_7 = arith.constant dense<0.000000e+00> : vector<16xf32>
    %13 = vector.multi_reduction <add>, %12, %cst_7 [1] : vector<16x32xf32> to vector<16xf32>
    %14 = vector.shape_cast %13 : vector<16xf32> to vector<16x1xf32>
    %cst_8 = arith.constant 3.200000e+01 : f32
    %15 = vector.broadcast %cst_8 : f32 to vector<16x1xf32>
    %16 = arith.divf %14, %15 : vector<16x1xf32>
    %17 = vector.broadcast %9 : vector<16x1xf32> to vector<16x32xf32>
    %18 = arith.subf %5, %17 : vector<16x32xf32>
    %cst_9 = arith.constant 9.99999974E-6 : f32
    %19 = vector.broadcast %cst_9 : f32 to vector<16x1xf32>
    %20 = arith.addf %16, %19 : vector<16x1xf32>
    %21 = math.rsqrt %20 : vector<16x1xf32>
    %22 = vector.broadcast %21 : vector<16x1xf32> to vector<16x32xf32>
    %23 = arith.mulf %18, %22 : vector<16x32xf32>
    %c0_10 = arith.constant 0 : index
    %c0_11 = arith.constant 0 : index
    %24 = vector.load %arg4[%c0_10, %c0_11] : memref<1x32xf32, #tpu.memory_space<vmem>>, vector<1x32xf32>
    %25 = vector.broadcast %24 : vector<1x32xf32> to vector<16x32xf32>
    %26 = arith.mulf %23, %25 : vector<16x32xf32>
    %c0_12 = arith.constant 0 : index
    %c0_13 = arith.constant 0 : index
    %27 = vector.load %arg5[%c0_12, %c0_13] : memref<1x32xf32, #tpu.memory_space<vmem>>, vector<1x32xf32>
    %28 = vector.broadcast %27 : vector<1x32xf32> to vector<16x32xf32>
    %29 = arith.addf %26, %28 : vector<16x32xf32>
    %c0_14 = arith.constant 0 : index
    %c0_15 = arith.constant 0 : index
    %30 = vector.load %arg6[%c0_14, %c0_15] : memref<16x32xf32, #tpu.memory_space<vmem>>, vector<16x32xf32>
    tpu.vector_store %arg6[%c0_14, %c0_15], %29 {strides = array<i32>} : memref<16x32xf32, #tpu.memory_space<vmem>>, vector<16x32xf32>,
    return
  }
  func.func @transform_0(%arg0: i32) -> (i32, i32) {
    %c0_i32 = arith.constant 0 : i32
    %c0_i32_0 = arith.constant 0 : i32
    return %arg0, %c0_i32 : i32, i32
  }
  func.func @transform_1(%arg0: i32) -> (i32, i32) {
    %c0_i32 = arith.constant 0 : i32
    %c0_i32_0 = arith.constant 0 : i32
    %c0_i32_1 = arith.constant 0 : i32
    return %c0_i32, %c0_i32_0 : i32, i32
  }
  func.func @transform_2(%arg0: i32) -> (i32, i32) {
    %c0_i32 = arith.constant 0 : i32
    %c0_i32_0 = arith.constant 0 : i32
    %c0_i32_1 = arith.constant 0 : i32
    return %c0_i32, %c0_i32_0 : i32, i32
  }
  func.func @transform_3(%arg0: i32) -> (i32, i32) {
    %c0_i32 = arith.constant 0 : i32
    %c0_i32_0 = arith.constant 0 : i32
    %c0_i32_1 = arith.constant 0 : i32
    return %c0_i32, %c0_i32_0 : i32, i32
  }
  func.func @transform_4(%arg0: i32) -> (i32, i32) {
    %c0_i32 = arith.constant 0 : i32
    %c0_i32_0 = arith.constant 0 : i32
    %c0_i32_1 = arith.constant 0 : i32
    return %c0_i32, %c0_i32_0 : i32, i32
  }
  func.func @transform_5(%arg0: i32) -> (i32, i32) {
    %c0_i32 = arith.constant 0 : i32
    %c0_i32_0 = arith.constant 0 : i32
    return %arg0, %c0_i32 : i32, i32
  }
}

</mosaic_0001>

<bundles_post_ra>
// kernel: tpu_custom_call.1
= control target key start
LH: loop header
LB: loop body
LE: loop exit
PB: predicated region body
PF: predicated region fallthrough
CT: control target
= control target key end

     0   :  { %v287_v1 = vmov 0.0   ;;  %vm288_vm0 = vmmov 0   ;;  %s367_s0 = inlined_call_operand.vmem [shape: bf16[16,128], index: 0, kind: input, shape index: {}]   ;;  %s368_s1 = inlined_call_operand.vmem [shape: bf16[128,32], index: 1, kind: input, shape index: {}]   ;;  %s369_s2 = inlined_call_operand.vmem [shape: f32[1,32], index: 2, kind: input, shape index: {}]   ;;  %s370_s3 = inlined_call_operand.vmem [shape: f32[1,32], index: 3, kind: input, shape index: {}]   ;;  %s371_s4 = inlined_call_operand.vmem [shape: f32[1,32], index: 4, kind: input, shape index: {}]   ;;  %s372_s5 = inlined_call_operand.hbm [shape: f32[16,32], index: 5, kind: output, shape index: {}]  }
   0x1   :  { %v252_v0 = vld [vmem:[%s368_s1 + $0x38] sm:$0xff]   ;;  %227 = vmatprep.subr.bf16.mxu0 %v287_v1  ;;  %v253_v2 = vld [vmem:[%s368_s1 + $0x30] sm:$0xff]   ;;  %243 = vmatprep.mubr.msk.bf16.mxu0 %vm288_vm0, %v287_v1  ;;  %v254_v3 = vld [vmem:[%s368_s1 + $0x28] sm:$0xff]  }
   0x2   :  { %228 = vmatpush3.bf16.msra.mxu0 %v252_v0 }
   0x3   :  { %229 = vmatprep.subr.bf16.mxu0 %v287_v1 }
   0x6   :  { %230 = vmatpush3.bf16.msra.mxu0 %v253_v2 }
   0x7   :  { %231 = vmatprep.subr.bf16.mxu0 %v287_v1 }
   0x8   :  { %10 = vsyncpa [#allocation3], 0  ;;  %v255_v4 = vld [vmem:[%s368_s1 + $0x20] sm:$0xff]   ;;  %v256_v5 = vld [vmem:[%s368_s1 + $0x18] sm:$0xff]   ;;  %vm142_vm1 = vcmask 261120   ;;  %s289_s14 = smov [#allocation2]  }
   0x9   :  { %v257_v6 = vld [vmem:[%s368_s1 + $0x10] sm:$0xff]   ;;  %v258_v7 = vld [vmem:[%s368_s1 + $0x8] sm:$0xff]   ;;  %v259_v8 = vld [vmem:[%s368_s1] sm:$0xff]   ;;  %s195_s15 = sshll.u32 %s289_s14, 4  ;;  %s196_s15 = int_to_ptr.vmem [resolvable:$true] %s195_s15 }
   0xa   :  { %232 = vmatpush3.bf16.msra.mxu0 %v254_v3  ;;  %v260_v9 = vld [vmem:[%s367_s0] sm:$0xff]   ;;  %s265_s16 = scalar_lea.vmem %s196_s15, 256  ;;  %p270_p1 = scmp.lt.s32.totalorder %s196_s15, %s196_s15 }
   0xb   :  { %233 = vmatprep.subr.bf16.mxu0 %v287_v1  ;;  %v206_v10 = vld [vmem:[%s369_s2] ss:$0 sm:$0xff]  ;;  %p266_p0 = scmp.ne.s32.totalorder %s196_s15, %s265_s16  ;;  %p271_p2 = scmp.lt.s32.totalorder %s265_s16, %s265_s16 }
   0xc   :  { %v216_v36 = vld [vmem:[%s370_s3] ss:$0 sm:$0xff] }
   0xd   :  { %v217_v38 = vld [vmem:[%s371_s4] ss:$0 sm:$0xff]  ;;  %p272_p3 = por %p271_p2, %p270_p1 }
   0xe   :  { %234 = vmatpush3.bf16.msra.mxu0 %v255_v4 }
   0xf   :  { %235 = vmatprep.subr.bf16.mxu0 %v287_v1  ;;  %p273_p4 = pnand %p272_p3, %p266_p0 }
  0x12   :  { %236 = vmatpush3.bf16.msra.mxu0 %v256_v5 }
  0x13   :  { %237 = vmatprep.subr.bf16.mxu0 %v287_v1 }
  0x16   :  { %238 = vmatpush3.bf16.msra.mxu0 %v257_v6 }
  0x17   :  { %239 = vmatprep.subr.bf16.mxu0 %v287_v1 }
  0x1a   :  { %240 = vmatpush3.bf16.msra.mxu0 %v258_v7 }
  0x1b   :  { %241 = vmatprep.subr.bf16.mxu0 %v287_v1 }
  0x1e   :  { %242 = vmatpush3.bf16.msra.mxu0 %v259_v8 }
  0x21   :  { %244 = vmatmul.mubr.bf16.vlgmr.msra.gmra.mxu0 %v260_v9 }
  0xe1   :  { %v135_v11 = vpop.f32.mrf.mxu0 }
  0xe2   :  { %v136_v12 = vadd.f32 %v206_v10, %v135_v11 }
  0xe3   :  { %v245_v13 = vpop.f32.mrf.mxu0 }
  0xe4   :  { %v143_v14 = vsel %vm142_vm1, %v136_v12, 0.0 }
  0xe5   :  { %144 = vadd.xlane.f32.xlu0 %v143_v14  ;;  %v138_v15 = vpop.f32.mrf.mxu0 }
  0xe6   :  { %v139_v16 = vadd.f32 %v206_v10, %v138_v15 }
  0xe7   :  { %v246_v17 = vpop.f32.mrf.mxu0 }
  0xe8   :  { %v146_v18 = vsel %vm142_vm1, %v139_v16, 0.0 }
  0xe9   :  { %147 = vadd.xlane.f32.xlu0 %v146_v18 }
 0x16e   :  { %v145_v19 = vpop.xlane.xlu0 %144 }
 0x16f   :  { %v150_v20 = vmul.f32 0.03125, %v145_v19 }
 0x171   :  { %v152_v21 = vsub.f32 %v136_v12, %v150_v20 }
 0x172   :  { %v148_v22 = vpop.xlane.xlu0 %147 }
 0x173   :  { %v151_v23 = vmul.f32 0.03125, %v148_v22  ;;  %v154_v24 = vmul.f32 %v152_v21, %v152_v21 }
 0x175   :  { %v153_v25 = vsub.f32 %v139_v16, %v151_v23  ;;  %v156_v26 = vsel %vm142_vm1, %v154_v24, 0.0 }
 0x176   :  { %157 = vadd.xlane.f32.xlu1 %v156_v26 }
 0x177   :  { %v155_v27 = vmul.f32 %v153_v25, %v153_v25 }
 0x179   :  { %v159_v28 = vsel %vm142_vm1, %v155_v27, 0.0 }
 0x17a   :  { %160 = vadd.xlane.f32.xlu1 %v159_v28 }
 0x1ff   :  { %v158_v29 = vpop.xlane.xlu1 %157 }
 0x200   :  { %v162_v30 = vmul.f32 0.03125, %v158_v29 }
 0x202   :  { %v164_v31 = vadd.f32 1e-05, %v162_v30 }
 0x203   :  { %v161_v32 = vpop.xlane.xlu1 %160 }
 0x204   :  { %261 = vrsqrt.f32 %v164_v31  ;;  %v163_v33 = vmul.f32 0.03125, %v161_v32 }
 0x206   :  { %v165_v34 = vadd.f32 1e-05, %v163_v33 }
 0x208   :  { %263 = vrsqrt.f32 %v165_v34 }
 0x211   :  { %v262_v35 = vpop.eup %261 }
 0x212   :  { %v168_v37 = vmul.f32 %v262_v35, %v152_v21 }
 0x214   :  { %v177_v39 = vmul.f32 %v216_v36, %v168_v37 }
 0x215   :  { %v264_v40 = vpop.eup %263 }
 0x216   :  { %v169_v41 = vmul.f32 %v264_v40, %v153_v25  ;;  %v186_v42 = vadd.f32 %v217_v38, %v177_v39 }
 0x218   :  { %v178_v43 = vmul.f32 %v216_v36, %v169_v41  ;;  %188 = vst.msk [vmem:[#allocation2] sm:$0xff] %vm142_vm1, %v186_v42 }
 0x21a   :  { %v187_v44 = vadd.f32 %v217_v38, %v178_v43 }
 0x21c   :  { %189 = vst.msk [vmem:[#allocation2 + $0x8] sm:$0xff] %vm142_vm1, %v187_v44 }
 0x21d   :  { %276 = shalt.err (!%p273_p4)
}
 0x21e   :  { %s290_s3 = smov 128   ;;  %s291_s4 = smov 8  }
 0x21f   :  { %201 = dma.vmem_to_hbm [thread:$0]  %s196_s15, 256, %s372_s5, [#allocation3], %s290_s3, %s290_s3, %s291_s4  }
 0x220   :  { %285 = dma.done.wait [#allocation3], 256  }
 0x221   :  { %286 = vsyncadd [#allocation3], 4294967040 }
 0x222   :  { %205 = vsyncpa [#allocation3], 1 }

</bundles_post_ra>
